<compile_context>
chip_gen: v5e
topology: v5e:2x2
jax: 0.10.0
libtpu: 0.0.40
codegen_flags: <defaults>
</compile_context>

<pallas_src>
import jax
import jax.numpy as jnp
from jax.experimental import pallas as pl
from jax.experimental.pallas import tpu as pltpu

LANES = 128     # lane width of a vreg
SUBLANES = 8    # sublane count of a vreg


def _round_up(v, m):
    return ((v + m - 1) // m) * m


def regression_kernel(w_ref, b_ref, x_ref, o_ref):
    # Elementwise affine transform on the VPU: out = w * x + b
    o_ref[...] = w_ref[0] * x_ref[...] + b_ref[0]


def regression_forward(x, w, b, *, max_tile_rows=4096):
    """x: f32[N]   w: f32[1]   b: f32[1]   -> f32[N]"""
    n = x.shape[0]
    # Enforce the (8, 128) block constraint on the caller-provided tile cap.
    max_tile_rows = max(SUBLANES, (max_tile_rows // SUBLANES) * SUBLANES)

    rows = pl.cdiv(n, LANES)
    padded = rows * LANES
    if padded != n:
        # Ragged n: a dense (rows, 128) view needs < 128 elements of padding.
        # TODO(synk): for huge ragged inputs, route the <128-element tail
        # through plain jnp instead to avoid this extra pad/slice pass.
        x = jnp.pad(x, (0, padded - n))
    x2d = x.reshape(rows, LANES)        # free: contiguous row-major reshape

    # Tile choice: big (up to 2 MiB) blocks, but keep >= 2 blocks whenever
    # possible so v7x's two TensorCores can split the grid.
    tile_rows = min(max_tile_rows, _round_up(pl.cdiv(rows, 2), SUBLANES))
    if tile_rows >= rows:
        tile_rows = rows                # single full-extent block (always legal)
    grid = (pl.cdiv(rows, tile_rows),)  # ragged final block is masked by Pallas

    out2d = pl.pallas_call(
        regression_kernel,
        out_shape=jax.ShapeDtypeStruct((rows, LANES), x.dtype),
        grid_spec=pltpu.PrefetchScalarGridSpec(
            num_scalar_prefetch=0,
            grid=grid,
            in_specs=[
                pl.BlockSpec(memory_space=pltpu.SMEM),               # w scalar
                pl.BlockSpec(memory_space=pltpu.SMEM),               # b scalar
                pl.BlockSpec((tile_rows, LANES), lambda i: (i, 0)),  # x tile
            ],
            out_specs=pl.BlockSpec((tile_rows, LANES), lambda i: (i, 0)),
        ),
        compiler_params=pltpu.CompilerParams(
            dimension_semantics=("parallel",),   # v7x: shard tiles over 2 TCs
            vmem_limit_bytes=32 * 1024 * 1024,   # safe on v5e/v6e/v7x (64 MiB)
        ),
    )(w, b, x2d)

    out = out2d.reshape(padded)         # free reshape back to 1-D
    return out if padded == n else out[:n]


if __name__ == "__main__":
    key = jax.random.PRNGKey(0)
    kw, kb, kx1, kx2 = jax.random.split(key, 4)

    # Deterministic parameter init mirroring nn.Parameter(torch.randn(1)).
    w = jax.random.normal(kw, (1,), dtype=jnp.float32)
    b = jax.random.normal(kb, (1,), dtype=jnp.float32)

    # 1) The exact input from the original module's script (N=5): one (1,128)
    #    full-extent block (tiny pad, sliced off).
    x_small = jnp.array([5.0, 7.0, 12.0, 16.0, 20.0], dtype=jnp.float32)
    y_small = regression_forward(x_small, w, b)
    jax.block_until_ready(y_small)
    assert jnp.allclose(y_small, w[0] * x_small + b[0], atol=1e-6), \
        "mismatch (small) vs reference"

    # 2) 128-aligned input: zero-copy wrapper (free reshapes only),
    #    rows=32 -> tile_rows=16 -> grid=(2,), both v7x cores get a block.
    x_big = jax.random.normal(kx1, (4096,), dtype=jnp.float32)
    y_big = regression_forward(x_big, w, b)
    jax.block_until_ready(y_big)
    assert jnp.allclose(y_big, w[0] * x_big + b[0], atol=1e-6), \
        "mismatch (big) vs reference"

    # 3) 128-aligned but rows (40) not a multiple of tile_rows (24):
    #    exercises the masked ragged final block with no padding at all.
    x_ragged = jax.random.normal(kx2, (5120,), dtype=jnp.float32)
    y_ragged = regression_forward(x_ragged, w, b)
    jax.block_until_ready(y_ragged)
    assert jnp.allclose(y_ragged, w[0] * x_ragged + b[0], atol=1e-6), \
        "mismatch (ragged) vs reference"

    print("KERNEL_OK")
</pallas_src>

<mosaic_0001>
module attributes {stable_mosaic.version = 11 : i64} {
  func.func @regression_kernel(%arg0: i32, %arg1: memref<1xf32, #tpu.memory_space<smem>>, %arg2: memref<1xf32, #tpu.memory_space<smem>>, %arg3: memref<1x128xf32, #tpu.memory_space<vmem>>, %arg4: memref<1x128xf32, #tpu.memory_space<vmem>>) attributes {dimension_semantics = [#tpu.dimension_semantics<parallel>], iteration_bounds = array<i64: 1>, scalar_prefetch = 0 : i64, scratch_operands = 0 : i64, tpu.core_type = #tpu.core_type<tc>, window_params = [{transform_indices = @transform_0, window_bounds = array<i64: 1>}, {transform_indices = @transform_1, window_bounds = array<i64: 1>}, {transform_indices = @transform_2, window_bounds = array<i64: 1, 128>}, {transform_indices = @transform_3, window_bounds = array<i64: 1, 128>}]} {
    %c0 = arith.constant 0 : index
    %0 = memref.load %arg1[%c0] : memref<1xf32, #tpu.memory_space<smem>>
    %c0_0 = arith.constant 0 : index
    %c0_1 = arith.constant 0 : index
    %1 = vector.load %arg3[%c0_0, %c0_1] : memref<1x128xf32, #tpu.memory_space<vmem>>, vector<1x128xf32>
    %2 = vector.broadcast %0 : f32 to vector<1x128xf32>
    %3 = arith.mulf %2, %1 : vector<1x128xf32>
    %c0_2 = arith.constant 0 : index
    %4 = memref.load %arg2[%c0_2] : memref<1xf32, #tpu.memory_space<smem>>
    %5 = vector.broadcast %4 : f32 to vector<1x128xf32>
    %6 = arith.addf %3, %5 : vector<1x128xf32>
    %c0_3 = arith.constant 0 : index
    %c0_4 = arith.constant 0 : index
    %7 = vector.load %arg4[%c0_3, %c0_4] : memref<1x128xf32, #tpu.memory_space<vmem>>, vector<1x128xf32>
    tpu.vector_store %arg4[%c0_3, %c0_4], %6 {strides = array<i32>} : memref<1x128xf32, #tpu.memory_space<vmem>>, vector<1x128xf32>,
    return
  }
  func.func @transform_0(%arg0: i32) -> i32 {
    %c0_i32 = arith.constant 0 : i32
    %c0_i32_0 = arith.constant 0 : i32
    return %c0_i32 : i32
  }
  func.func @transform_1(%arg0: i32) -> i32 {
    %c0_i32 = arith.constant 0 : i32
    %c0_i32_0 = arith.constant 0 : i32
    return %c0_i32 : i32
  }
  func.func @transform_2(%arg0: i32) -> (i32, i32) {
    %c0_i32 = arith.constant 0 : i32
    %c0_i32_0 = arith.constant 0 : i32
    return %arg0, %c0_i32 : i32, i32
  }
  func.func @transform_3(%arg0: i32) -> (i32, i32) {
    %c0_i32 = arith.constant 0 : i32
    %c0_i32_0 = arith.constant 0 : i32
    return %arg0, %c0_i32 : i32, i32
  }
}

</mosaic_0001>

<bundles_post_ra>
// kernel: tpu_custom_call.1
= control target key start
LH: loop header
LB: loop body
LE: loop exit
PB: predicated region body
PF: predicated region fallthrough
CT: control target
= control target key end

     0   :  { %s101_s0 = inlined_call_operand.<no memory space> [shape: f32[1], index: 0, kind: input, shape index: {}]   ;;  %s102_s1 = inlined_call_operand.<no memory space> [shape: f32[1], index: 1, kind: input, shape index: {}]   ;;  %s103_s2 = inlined_call_operand.vmem [shape: f32[1,128], index: 2, kind: input, shape index: {}]   ;;  %s104_s3 = inlined_call_operand.hbm [shape: f32[1,128], index: 3, kind: output, shape index: {}]  }
   0x1   :  { %v18_v0 = vld [vmem:[%s103_s2] sm:$0x1]  ;;  %v19_v1 = vstv %s101_s0  ;;  %v22_v2 = vstv %s102_s1 }
   0x2   :  { %10 = vsyncpa [#allocation5], 0  ;;  %s32_s20 = sshll.u32 %s104_s3, 4  ;;  %v20_v3 = vmul.f32 %v19_v1, %v18_v0  ;;  %s68_s21 = smov [#allocation4]   ;;  %s33_s20 = int_to_ptr.hbm [resolvable:$true] %s32_s20 }
   0x3   :  { %s30_s22 = sshll.u32 %s68_s21, 4  ;;  %s31_s22 = int_to_ptr.vmem [resolvable:$true] %s30_s22 }
   0x4   :  { %v23_v4 = vadd.f32 %v22_v2, %v20_v3 }
   0x6   :  { %24 = vst [vmem:[#allocation4] sm:$0x1] %v23_v4 }
   0x7   :  { %35 = dma.vmem_to_hbm [thread:$0]  %s31_s22, 16, %s33_s20, [#allocation5]  }
   0x8   :  { %66 = dma.done.wait [#allocation5], 16  }
   0x9   :  { %67 = vsyncadd [#allocation5], 4294967280 }
   0xa   :  { %40 = vsyncpa [#allocation5], 1 }

</bundles_post_ra>
